<compile_context>
chip_gen: v6e
topology: v6e:2x2x1
jax: 0.10.0
libtpu: 0.0.40
codegen_flags: <defaults>
</compile_context>

<pallas_src>
import functools

import jax
import jax.numpy as jnp
from jax.experimental import pallas as pl
from jax.experimental.pallas import tpu as pltpu


def _pad_to(n, m):
    return ((n + m - 1) // m) * m


# ----------------------------------------------------------------------------
# Fused multi-layer EIANN forward kernel (+ per-tile loss / accuracy sums)
# ----------------------------------------------------------------------------
def eiann_fused_kernel(x_ref, y_ref, *rest,
                       num_layers, out_pad, num_classes, batch_actual, tb):
    wb_refs = rest[:2 * num_layers]
    out_ref = rest[2 * num_layers]          # (1, 8, 128) f32 per batch tile

    # Layer 0 weights already fold xI = x, so the running slab starts as x itself.
    xcat = x_ref[...]                       # bf16 [TB, In_pad]
    logits = None
    for l in range(num_layers):
        w = wb_refs[2 * l][...]             # bf16 [K_pad, 2*Out_pad]
        b = wb_refs[2 * l + 1][...]         # f32  [1, 2*Out_pad]  (= [bE || bI])
        # One MXU matmul per layer; bf16 operands, f32 accumulation.
        z = jnp.dot(xcat, w, preferred_element_type=jnp.float32) + b
        if l < num_layers - 1:
            # relu on the fused slab gives [relu(zE) || relu(zI)] = [xE || xI];
            # store bf16 to halve VMEM/vreg pressure of the live activation slab.
            xcat = jnp.maximum(z, 0.0).astype(jnp.bfloat16)
        else:
            # useInbuiltCrossEntropyLossFunction -> logits are raw zE
            logits = z[:, :out_pad]

    rows = logits.shape[0]
    col = jax.lax.broadcasted_iota(jnp.int32, (rows, out_pad), 1)
    neg = jnp.float32(-1e30)
    lm = jnp.where(col < num_classes, logits, neg)        # mask padded classes

    # Softmax stats only (EUP exp/log, XLU reductions); no full logp slab.
    m = jnp.max(lm, axis=-1, keepdims=True)
    s = jnp.sum(jnp.exp(lm - m), axis=-1, keepdims=True)

    # NLL of the true class via one-hot (iota compare, no gather):
    #   nll = (m + log s) - logit_true
    y2 = y_ref[...]                                       # int32 [TB, 1]
    onehot = col == y2
    true_logit = jnp.sum(jnp.where(onehot, lm, 0.0), axis=-1, keepdims=True)
    nll = (m + jnp.log(s)) - true_logit

    # top-1 prediction = first index attaining the max (torch.argmax tie-break);
    # exact while class indices < 2^24 (representable in f32).
    cand = jnp.where(lm == m, col.astype(jnp.float32), jnp.float32(out_pad))
    pred = jnp.min(cand, axis=-1, keepdims=True)
    correct = (pred == y2.astype(jnp.float32)).astype(jnp.float32)

    # exclude padded batch rows (global row index >= batch_actual) from the sums
    row_global = (pl.program_id(0) * tb
                  + jax.lax.broadcasted_iota(jnp.int32, (rows, 1), 0))
    rvalid = (row_global < batch_actual).astype(jnp.float32)

    loss_sum = jnp.sum(nll * rvalid)
    acc_sum = jnp.sum(correct * rvalid)

    # Per-tile partial sums into a lane-dense (1,8,128) slab:
    #   [0,0,0] = sum of NLL, [0,0,1] = sum of correct.
    r8 = jax.lax.broadcasted_iota(jnp.int32, (1, 8, 128), 1)
    c128 = jax.lax.broadcasted_iota(jnp.int32, (1, 8, 128), 2)
    slab = jnp.where((r8 == 0) & (c128 == 0), loss_sum, jnp.float32(0.0))
    slab = jnp.where((r8 == 0) & (c128 == 1), acc_sum, slab)
    out_ref[...] = slab


# ----------------------------------------------------------------------------
# Parameter init: raw E/I weights -> padded, pre-concatenated, bf16 blocks.
# Layer 0 folds xI = x into the weights: W0 = [wEe+wEi || wIe+wIi].
# ----------------------------------------------------------------------------
def init_params(key, input_size, hidden_size, output_size, num_layers):
    layers = []
    in_f = input_size
    for layer_idx in range(num_layers):
        out_f = output_size if layer_idx == num_layers - 1 else hidden_size
        key, k1, k2, k3, k4 = jax.random.split(key, 5)
        scale = 1.0 / jnp.sqrt(jnp.float32(in_f))
        # sign=True -> positive (Ee, Ie); sign=False -> negative (Ei, Ii)
        wEe = jnp.abs(jax.random.normal(k1, (in_f, out_f), jnp.float32)) * scale
        wEi = -jnp.abs(jax.random.normal(k2, (in_f, out_f), jnp.float32)) * scale
        wIe = jnp.abs(jax.random.normal(k3, (in_f, out_f), jnp.float32)) * scale
        wIi = -jnp.abs(jax.random.normal(k4, (in_f, out_f), jnp.float32)) * scale
        # combined biases (bEe+bEi, bIe+bIi), deterministic zeros
        bE = jnp.zeros((out_f,), jnp.float32)
        bI = jnp.zeros((out_f,), jnp.float32)

        in_p = _pad_to(in_f, 128)
        out_p = _pad_to(out_f, 128)

        def padw(w):
            return jnp.zeros((in_p, out_p), jnp.float32).at[:in_f, :out_f].set(w)

        if layer_idx == 0:
            # Fold xI = xE = x into layer-0 weights:
            #   zE = x @ (wEe + wEi),  zI = x @ (wIe + wIi)
            wcat = jnp.zeros((in_p, 2 * out_p), jnp.float32)
            wcat = wcat.at[:, :out_p].set(padw(wEe) + padw(wEi))
            wcat = wcat.at[:, out_p:].set(padw(wIe) + padw(wIi))
        else:
            # Wcat = [[wEe, wIe], [wEi, wIi]]  so  [xE||xI] @ Wcat = [zE || zI]
            wcat = jnp.zeros((2 * in_p, 2 * out_p), jnp.float32)
            wcat = wcat.at[:in_p, :out_p].set(padw(wEe))
            wcat = wcat.at[:in_p, out_p:].set(padw(wIe))
            wcat = wcat.at[in_p:, :out_p].set(padw(wEi))
            wcat = wcat.at[in_p:, out_p:].set(padw(wIi))

        bcat = jnp.zeros((1, 2 * out_p), jnp.float32)
        bcat = bcat.at[0, :out_f].set(bE)
        bcat = bcat.at[0, out_p:out_p + out_f].set(bI)

        layers.append((wcat.astype(jnp.bfloat16), bcat))
        in_f = out_f
    return layers


# ----------------------------------------------------------------------------
# Forward pass (trainOrTest=False): returns (loss, accuracy)
# ----------------------------------------------------------------------------
def eiann_forward(layers, x, y, input_size, output_size):
    batch = x.shape[0]
    in_p = _pad_to(input_size, 128)
    num_layers = len(layers)
    out_pad_last = layers[-1][0].shape[1] // 2

    # Batch tile: up to 256 rows per grid step (MXU-row friendly on v6e/v7x;
    # also fine on v5e). Tiny batches collapse to a single tile.
    bp8 = _pad_to(batch, 8)
    tb = 256 if bp8 >= 256 else (128 if bp8 >= 128 else bp8)
    bp = _pad_to(batch, tb)
    num_tiles = bp // tb

    # xE = xI = x (useInputActivations) is folded into the layer-0 weights, so the
    # kernel input is just x, padded lane-dense and cast to bf16 (MXU operand dtype).
    x_pad = (jnp.zeros((bp, in_p), jnp.float32)
             .at[:batch, :input_size].set(x)).astype(jnp.bfloat16)
    y_pad = jnp.zeros((bp, 1), jnp.int32).at[:batch, 0].set(y.astype(jnp.int32))

    kernel = functools.partial(
        eiann_fused_kernel,
        num_layers=num_layers,
        out_pad=out_pad_last,
        num_classes=output_size,
        batch_actual=batch,
        tb=tb,
    )

    flat_wb = []
    wb_specs = []
    for w, b in layers:
        flat_wb += [w, b]
        # Constant index_map -> weights/biases DMA'd once, not per batch tile.
        wb_specs.append(pl.BlockSpec(w.shape, lambda i: (0, 0)))
        wb_specs.append(pl.BlockSpec(b.shape, lambda i: (0, 0)))

    in_specs = [
        pl.BlockSpec((tb, in_p), lambda i: (i, 0)),   # x tile
        pl.BlockSpec((tb, 1), lambda i: (i, 0)),      # y tile
    ] + wb_specs
    out_spec = pl.BlockSpec((1, 8, 128), lambda i: (i, 0, 0))

    # Explicit VMEM budget: resident weights (+ double-buffer slack for the batch
    # tiles / activations) with headroom; clamp to sane bounds.
    weight_bytes = sum(int(w.size) * w.dtype.itemsize + int(b.size) * b.dtype.itemsize
                       for w, b in layers)
    max_width = max(int(w.shape[1]) for w, _ in layers)
    act_bytes = tb * (in_p + 4 * max_width) * 4
    vmem_limit = int(min(120 << 20, max(32 << 20, 2 * weight_bytes + 8 * act_bytes)))

    partials = pl.pallas_call(
        kernel,
        out_shape=jax.ShapeDtypeStruct((num_tiles, 8, 128), jnp.float32),
        grid=(num_tiles,),
        in_specs=in_specs,
        out_specs=out_spec,
        compiler_params=pltpu.CompilerParams(
            dimension_semantics=("parallel",),
            vmem_limit_bytes=vmem_limit,
        ),
    )(x_pad, y_pad, *flat_wb)

    inv_b = jnp.float32(1.0 / batch)
    loss = jnp.sum(partials[:, 0, 0]) * inv_b
    acc = jnp.sum(partials[:, 0, 1]) * inv_b
    return loss, acc


if __name__ == "__main__":
    batch = 8
    input_size = 16
    hidden_size = 32
    output_size = 8
    num_layers = 3

    key = jax.random.PRNGKey(0)
    k_x, k_y, k_p = jax.random.split(key, 3)
    x = jax.random.normal(k_x, (batch, input_size), jnp.float32)
    y = jax.random.randint(k_y, (batch,), 0, output_size, jnp.int32)
    layers = init_params(k_p, input_size, hidden_size, output_size, num_layers)

    loss, acc = eiann_forward(layers, x, y, input_size, output_size)
    jax.block_until_ready((loss, acc))
    print("KERNEL_OK")
</pallas_src>

<mosaic_0001>
module attributes {stable_mosaic.version = 11 : i64} {
  func.func @eiann_fused_kernel(%arg0: i32, %arg1: memref<8x128xbf16, #tpu.memory_space<vmem>>, %arg2: memref<8x1xi32, #tpu.memory_space<vmem>>, %arg3: memref<128x256xbf16, #tpu.memory_space<vmem>>, %arg4: memref<1x256xf32, #tpu.memory_space<vmem>>, %arg5: memref<256x256xbf16, #tpu.memory_space<vmem>>, %arg6: memref<1x256xf32, #tpu.memory_space<vmem>>, %arg7: memref<256x256xbf16, #tpu.memory_space<vmem>>, %arg8: memref<1x256xf32, #tpu.memory_space<vmem>>, %arg9: memref<1x8x128xf32, #tpu.memory_space<vmem>>) attributes {dimension_semantics = [#tpu.dimension_semantics<parallel>], iteration_bounds = array<i64: 1>, scalar_prefetch = 0 : i64, scratch_operands = 0 : i64, tpu.core_type = #tpu.core_type<tc>, window_params = [{transform_indices = @transform_0, window_bounds = array<i64: 8, 128>}, {transform_indices = @transform_1, window_bounds = array<i64: 8, 1>}, {pipeline_mode = #tpu.pipeline_mode<synchronous>, transform_indices = @transform_2, window_bounds = array<i64: 128, 256>}, {pipeline_mode = #tpu.pipeline_mode<synchronous>, transform_indices = @transform_3, window_bounds = array<i64: 1, 256>}, {pipeline_mode = #tpu.pipeline_mode<synchronous>, transform_indices = @transform_4, window_bounds = array<i64: 256, 256>}, {pipeline_mode = #tpu.pipeline_mode<synchronous>, transform_indices = @transform_5, window_bounds = array<i64: 1, 256>}, {pipeline_mode = #tpu.pipeline_mode<synchronous>, transform_indices = @transform_6, window_bounds = array<i64: 256, 256>}, {pipeline_mode = #tpu.pipeline_mode<synchronous>, transform_indices = @transform_7, window_bounds = array<i64: 1, 256>}, {transform_indices = @transform_8, window_bounds = array<i64: 1, 8, 128>}]} {
    %c0 = arith.constant 0 : index
    %c0_0 = arith.constant 0 : index
    %0 = vector.load %arg1[%c0, %c0_0] : memref<8x128xbf16, #tpu.memory_space<vmem>>, vector<8x128xbf16>
    %c0_1 = arith.constant 0 : index
    %c0_2 = arith.constant 0 : index
    %1 = vector.load %arg3[%c0_1, %c0_2] : memref<128x256xbf16, #tpu.memory_space<vmem>>, vector<128x256xbf16>
    %c0_3 = arith.constant 0 : index
    %c0_4 = arith.constant 0 : index
    %2 = vector.load %arg4[%c0_3, %c0_4] : memref<1x256xf32, #tpu.memory_space<vmem>>, vector<1x256xf32>
    %cst = arith.constant dense<0.000000e+00> : vector<8x256xf32>
    %3 = tpu.matmul %0, %1, %cst {dimension_numbers = #tpu.dot_dimension_numbers<[1], [0], [0], [1], [0, 0, 1, 1], [], []>} : vector<8x128xbf16>, vector<128x256xbf16>, vector<8x256xf32> -> vector<8x256xf32>
    %4 = vector.broadcast %2 : vector<1x256xf32> to vector<8x256xf32>
    %5 = arith.addf %3, %4 : vector<8x256xf32>
    %cst_5 = arith.constant 0.000000e+00 : f32
    %6 = vector.broadcast %cst_5 : f32 to vector<8x256xf32>
    %7 = arith.maximumf %5, %6 : vector<8x256xf32>
    %8 = arith.truncf %7 : vector<8x256xf32> to vector<8x256xbf16>
    %c0_6 = arith.constant 0 : index
    %c0_7 = arith.constant 0 : index
    %9 = vector.load %arg5[%c0_6, %c0_7] : memref<256x256xbf16, #tpu.memory_space<vmem>>, vector<256x256xbf16>
    %c0_8 = arith.constant 0 : index
    %c0_9 = arith.constant 0 : index
    %10 = vector.load %arg6[%c0_8, %c0_9] : memref<1x256xf32, #tpu.memory_space<vmem>>, vector<1x256xf32>
    %cst_10 = arith.constant dense<0.000000e+00> : vector<8x256xf32>
    %11 = tpu.matmul %8, %9, %cst_10 {dimension_numbers = #tpu.dot_dimension_numbers<[1], [0], [0], [1], [0, 0, 1, 1], [], []>} : vector<8x256xbf16>, vector<256x256xbf16>, vector<8x256xf32> -> vector<8x256xf32>
    %12 = vector.broadcast %10 : vector<1x256xf32> to vector<8x256xf32>
    %13 = arith.addf %11, %12 : vector<8x256xf32>
    %cst_11 = arith.constant 0.000000e+00 : f32
    %14 = vector.broadcast %cst_11 : f32 to vector<8x256xf32>
    %15 = arith.maximumf %13, %14 : vector<8x256xf32>
    %16 = arith.truncf %15 : vector<8x256xf32> to vector<8x256xbf16>
    %c0_12 = arith.constant 0 : index
    %c0_13 = arith.constant 0 : index
    %17 = vector.load %arg7[%c0_12, %c0_13] : memref<256x256xbf16, #tpu.memory_space<vmem>>, vector<256x256xbf16>
    %c0_14 = arith.constant 0 : index
    %c0_15 = arith.constant 0 : index
    %18 = vector.load %arg8[%c0_14, %c0_15] : memref<1x256xf32, #tpu.memory_space<vmem>>, vector<1x256xf32>
    %cst_16 = arith.constant dense<0.000000e+00> : vector<8x256xf32>
    %19 = tpu.matmul %16, %17, %cst_16 {dimension_numbers = #tpu.dot_dimension_numbers<[1], [0], [0], [1], [0, 0, 1, 1], [], []>} : vector<8x256xbf16>, vector<256x256xbf16>, vector<8x256xf32> -> vector<8x256xf32>
    %20 = vector.broadcast %18 : vector<1x256xf32> to vector<8x256xf32>
    %21 = arith.addf %19, %20 : vector<8x256xf32>
    %22 = vector.extract_strided_slice %21 {offsets = [0, 0], sizes = [8, 128], strides = [1, 1]} : vector<8x256xf32> to vector<8x128xf32>
    %23 = tpu.iota {dimensions = array<i32: 1>} : vector<8x128xi32>
    %c8_i32 = arith.constant 8 : i32
    %24 = vector.broadcast %c8_i32 : i32 to vector<8x128xi32>
    %25 = arith.cmpi slt, %23, %24 : vector<8x128xi32>
    %cst_17 = arith.constant -1.000000e+30 : f32
    %26 = vector.broadcast %cst_17 : f32 to vector<8x128xf32>
    %27 = arith.select %25, %22, %26 : vector<8x128xi1>, vector<8x128xf32>
    %cst_18 = arith.constant dense<0xFF800000> : vector<8xf32>
    %28 = vector.multi_reduction <maximumf>, %27, %cst_18 [1] : vector<8x128xf32> to vector<8xf32>
    %29 = vector.shape_cast %28 : vector<8xf32> to vector<8x1xf32>
    %30 = vector.broadcast %29 : vector<8x1xf32> to vector<8x128xf32>
    %31 = arith.subf %27, %30 : vector<8x128xf32>
    %32 = math.exp %31 : vector<8x128xf32>
    %cst_19 = arith.constant dense<0.000000e+00> : vector<8xf32>
    %33 = vector.multi_reduction <add>, %32, %cst_19 [1] : vector<8x128xf32> to vector<8xf32>
    %34 = vector.shape_cast %33 : vector<8xf32> to vector<8x1xf32>
    %c0_20 = arith.constant 0 : index
    %c0_21 = arith.constant 0 : index
    %35 = vector.load %arg2[%c0_20, %c0_21] : memref<8x1xi32, #tpu.memory_space<vmem>>, vector<8x1xi32>
    %36 = vector.broadcast %35 : vector<8x1xi32> to vector<8x128xi32>
    %37 = arith.cmpi eq, %23, %36 : vector<8x128xi32>
    %cst_22 = arith.constant 0.000000e+00 : f32
    %38 = vector.broadcast %cst_22 : f32 to vector<8x128xf32>
    %39 = arith.select %37, %27, %38 : vector<8x128xi1>, vector<8x128xf32>
    %cst_23 = arith.constant dense<0.000000e+00> : vector<8xf32>
    %40 = vector.multi_reduction <add>, %39, %cst_23 [1] : vector<8x128xf32> to vector<8xf32>
    %41 = vector.shape_cast %40 : vector<8xf32> to vector<8x1xf32>
    %42 = math.log %34 : vector<8x1xf32>
    %43 = arith.addf %29, %42 : vector<8x1xf32>
    %44 = arith.subf %43, %41 : vector<8x1xf32>
    %45 = vector.broadcast %29 : vector<8x1xf32> to vector<8x128xf32>
    %46 = arith.cmpf oeq, %27, %45 : vector<8x128xf32>
    %47 = arith.sitofp %23 : vector<8x128xi32> to vector<8x128xf32>
    %cst_24 = arith.constant 1.280000e+02 : f32
    %48 = vector.broadcast %cst_24 : f32 to vector<8x128xf32>
    %49 = arith.select %46, %47, %48 : vector<8x128xi1>, vector<8x128xf32>
    %cst_25 = arith.constant dense<0x7F800000> : vector<8xf32>
    %50 = vector.multi_reduction <minimumf>, %49, %cst_25 [1] : vector<8x128xf32> to vector<8xf32>
    %51 = vector.shape_cast %50 : vector<8xf32> to vector<8x1xf32>
    %52 = arith.sitofp %35 : vector<8x1xi32> to vector<8x1xf32>
    %53 = arith.cmpf oeq, %51, %52 : vector<8x1xf32>
    %54 = arith.extui %53 : vector<8x1xi1> to vector<8x1xi32>
    %55 = arith.sitofp %54 : vector<8x1xi32> to vector<8x1xf32>
    %c8_i32_26 = arith.constant 8 : i32
    %56 = arith.muli %arg0, %c8_i32_26 : i32
    %57 = tpu.iota {dimensions = array<i32: 0>} : vector<8x1xi32>
    %58 = vector.broadcast %56 : i32 to vector<8x1xi32>
    %59 = arith.addi %58, %57 : vector<8x1xi32>
    %c8_i32_27 = arith.constant 8 : i32
    %60 = vector.broadcast %c8_i32_27 : i32 to vector<8x1xi32>
    %61 = arith.cmpi slt, %59, %60 : vector<8x1xi32>
    %62 = arith.extui %61 : vector<8x1xi1> to vector<8x1xi32>
    %63 = arith.sitofp %62 : vector<8x1xi32> to vector<8x1xf32>
    %64 = arith.mulf %44, %63 : vector<8x1xf32>
    %65 = vector.shape_cast %64 : vector<8x1xf32> to vector<1x8x1xf32>
    %cst_28 = arith.constant dense<0.000000e+00> : vector<1xf32>
    %66 = vector.multi_reduction <add>, %65, %cst_28 [1, 2] : vector<1x8x1xf32> to vector<1xf32>
    %67 = vector.shape_cast %66 : vector<1xf32> to vector<1x1x1xf32>
    %68 = vector.extract %67[0, 0, 0] : f32 from vector<1x1x1xf32>
    %69 = arith.mulf %55, %63 : vector<8x1xf32>
    %70 = vector.shape_cast %69 : vector<8x1xf32> to vector<1x8x1xf32>
    %cst_29 = arith.constant dense<0.000000e+00> : vector<1xf32>
    %71 = vector.multi_reduction <add>, %70, %cst_29 [1, 2] : vector<1x8x1xf32> to vector<1xf32>
    %72 = vector.shape_cast %71 : vector<1xf32> to vector<1x1x1xf32>
    %73 = vector.extract %72[0, 0, 0] : f32 from vector<1x1x1xf32>
    %74 = tpu.iota {dimensions = array<i32: 1>} : vector<1x8x128xi32>
    %75 = tpu.iota {dimensions = array<i32: 2>} : vector<1x8x128xi32>
    %c0_i32 = arith.constant 0 : i32
    %76 = vector.broadcast %c0_i32 : i32 to vector<1x8x128xi32>
    %77 = arith.cmpi eq, %74, %76 : vector<1x8x128xi32>
    %c0_i32_30 = arith.constant 0 : i32
    %78 = vector.broadcast %c0_i32_30 : i32 to vector<1x8x128xi32>
    %79 = arith.cmpi eq, %75, %78 : vector<1x8x128xi32>
    %80 = arith.andi %77, %79 : vector<1x8x128xi1>
    %cst_31 = arith.constant 0.000000e+00 : f32
    %81 = vector.broadcast %68 : f32 to vector<1x8x128xf32>
    %82 = vector.broadcast %cst_31 : f32 to vector<1x8x128xf32>
    %83 = arith.select %80, %81, %82 : vector<1x8x128xi1>, vector<1x8x128xf32>
    %c0_i32_32 = arith.constant 0 : i32
    %84 = vector.broadcast %c0_i32_32 : i32 to vector<1x8x128xi32>
    %85 = arith.cmpi eq, %74, %84 : vector<1x8x128xi32>
    %c1_i32 = arith.constant 1 : i32
    %86 = vector.broadcast %c1_i32 : i32 to vector<1x8x128xi32>
    %87 = arith.cmpi eq, %75, %86 : vector<1x8x128xi32>
    %88 = arith.andi %85, %87 : vector<1x8x128xi1>
    %89 = vector.broadcast %73 : f32 to vector<1x8x128xf32>
    %90 = arith.select %88, %89, %83 : vector<1x8x128xi1>, vector<1x8x128xf32>
    %c0_33 = arith.constant 0 : index
    %c0_34 = arith.constant 0 : index
    %c0_35 = arith.constant 0 : index
    %91 = vector.load %arg9[%c0_33, %c0_34, %c0_35] : memref<1x8x128xf32, #tpu.memory_space<vmem>>, vector<1x8x128xf32>
    tpu.vector_store %arg9[%c0_33, %c0_34, %c0_35], %90 {strides = array<i32>} : memref<1x8x128xf32, #tpu.memory_space<vmem>>, vector<1x8x128xf32>,
    return
  }
  func.func @transform_0(%arg0: i32) -> (i32, i32) {
    %c0_i32 = arith.constant 0 : i32
    %c0_i32_0 = arith.constant 0 : i32
    return %arg0, %c0_i32 : i32, i32
  }
  func.func @transform_1(%arg0: i32) -> (i32, i32) {
    %c0_i32 = arith.constant 0 : i32
    %c0_i32_0 = arith.constant 0 : i32
    return %arg0, %c0_i32 : i32, i32
  }
  func.func @transform_2(%arg0: i32) -> (i32, i32) {
    %c0_i32 = arith.constant 0 : i32
    %c0_i32_0 = arith.constant 0 : i32
    %c0_i32_1 = arith.constant 0 : i32
    return %c0_i32, %c0_i32_0 : i32, i32
  }
  func.func @transform_3(%arg0: i32) -> (i32, i32) {
    %c0_i32 = arith.constant 0 : i32
    %c0_i32_0 = arith.constant 0 : i32
    %c0_i32_1 = arith.constant 0 : i32
    return %c0_i32, %c0_i32_0 : i32, i32
  }
  func.func @transform_4(%arg0: i32) -> (i32, i32) {
    %c0_i32 = arith.constant 0 : i32
    %c0_i32_0 = arith.constant 0 : i32
    %c0_i32_1 = arith.constant 0 : i32
    return %c0_i32, %c0_i32_0 : i32, i32
  }
  func.func @transform_5(%arg0: i32) -> (i32, i32) {
    %c0_i32 = arith.constant 0 : i32
    %c0_i32_0 = arith.constant 0 : i32
    %c0_i32_1 = arith.constant 0 : i32
    return %c0_i32, %c0_i32_0 : i32, i32
  }
  func.func @transform_6(%arg0: i32) -> (i32, i32) {
    %c0_i32 = arith.constant 0 : i32
    %c0_i32_0 = arith.constant 0 : i32
    %c0_i32_1 = arith.constant 0 : i32
    return %c0_i32, %c0_i32_0 : i32, i32
  }
  func.func @transform_7(%arg0: i32) -> (i32, i32) {
    %c0_i32 = arith.constant 0 : i32
    %c0_i32_0 = arith.constant 0 : i32
    %c0_i32_1 = arith.constant 0 : i32
    return %c0_i32, %c0_i32_0 : i32, i32
  }
  func.func @transform_8(%arg0: i32) -> (i32, i32, i32) {
    %c0_i32 = arith.constant 0 : i32
    %c0_i32_0 = arith.constant 0 : i32
    %c0_i32_1 = arith.constant 0 : i32
    return %arg0, %c0_i32, %c0_i32_0 : i32, i32, i32
  }
}

</mosaic_0001>

<bundles_post_ra>
// kernel: tpu_custom_call.1
= control target key start
LH: loop header
LB: loop body
LE: loop exit
PB: predicated region body
PF: predicated region fallthrough
CT: control target
= control target key end

     0   :  { %13 = vsyncpa [#allocation3], 0  ;;  %s1199_s0 = inlined_call_operand.vmem [shape: bf16[8,128], index: 0, kind: input, shape index: {}]   ;;  %s1200_s1 = inlined_call_operand.vmem [shape: s32[8,1], index: 1, kind: input, shape index: {}]   ;;  %s1201_s2 = inlined_call_operand.hbm [shape: bf16[128,256], index: 2, kind: input, shape index: {}]   ;;  %s1202_s3 = inlined_call_operand.vmem [shape: f32[1,256], index: 3, kind: input, shape index: {}]   ;;  %s1203_s4 = inlined_call_operand.hbm [shape: bf16[256,256], index: 4, kind: input, shape index: {}]   ;;  %s1204_s5 = inlined_call_operand.vmem [shape: f32[1,256], index: 5, kind: input, shape index: {}]   ;;  %s1205_s6 = inlined_call_operand.hbm [shape: bf16[256,256], index: 6, kind: input, shape index: {}]   ;;  %s1206_s7 = inlined_call_operand.vmem [shape: f32[1,256], index: 7, kind: input, shape index: {}]   ;;  %s1207_s8 = inlined_call_operand.hbm [shape: f32[1,8,128], index: 8, kind: output, shape index: {}]  }
   0x1   :  { %14 = vsyncpa [#allocation6], 0 }
   0x2   :  { %15 = vsyncpa [#allocation4], 0  ;;  %s1107_s27 = smov [#allocation5]   ;;  %s1108_s29 = smov [#allocation2]  }
   0x3   :  { %s39_s28 = sshll.u32 %s1107_s27, 4  ;;  %s25_s30 = sshll.u32 %s1108_s29, 4  ;;  %s40_s28 = int_to_ptr.vmem [resolvable:$true] %s39_s28  ;;  %s26_s30 = int_to_ptr.vmem [resolvable:$true] %s25_s30 }
   0x4   :  { %s1029_s9 = scalar_lea.vmem %s40_s28, 4096  ;;  %p1034_p1 = scmp.lt.s32.totalorder %s40_s28, %s40_s28 }
   0x5   :  { %p1030_p0 = scmp.ne.s32.totalorder %s40_s28, %s1029_s9  ;;  %p1035_p2 = scmp.lt.s32.totalorder %s1029_s9, %s1029_s9 }
   0x7   :  { %p1036_p3 = por %p1035_p2, %p1034_p1 }
   0x9   :  { %p1037_p4 = pnand %p1036_p3, %p1030_p0 }
   0xb   :  { %1040 = shalt.err (!%p1037_p4)
}
   0xc   :  { %s1109_s10 = smov 128   ;;  %s1110_s11 = smov 8  }
   0xd   :  { %45 = dma.hbm_to_vmem [thread:$0]  %s1203_s4, 4096, %s40_s28, [#allocation6], %s1109_s10, %s1109_s10, %s1110_s11  }
   0xe   :  { %s1049_s14 = scalar_lea.vmem %s26_s30, 2048  ;;  %p1054_p6 = scmp.lt.s32.totalorder %s26_s30, %s26_s30 }
   0xf   :  { %p1050_p5 = scmp.ne.s32.totalorder %s26_s30, %s1049_s14  ;;  %p1055_p7 = scmp.lt.s32.totalorder %s1049_s14, %s1049_s14 }
  0x11   :  { %p1056_p8 = por %p1055_p7, %p1054_p6 }
  0x13   :  { %p1057_p9 = pnand %p1056_p8, %p1050_p5 }
  0x15   :  { %1060 = shalt.err (!%p1057_p9)
}
  0x16   :  { %31 = dma.hbm_to_vmem [thread:$0]  %s1201_s2, 2048, %s26_s30, [#allocation3], %s1109_s10, %s1109_s10, %s1110_s11  }
  0x17   :  { %s1111_s17 = smov [#allocation7]  }
  0x18   :  { %s53_s18 = sshll.u32 %s1111_s17, 4  ;;  %s54_s18 = int_to_ptr.vmem [resolvable:$true] %s53_s18 }
  0x19   :  { %s1069_s19 = scalar_lea.vmem %s54_s18, 4096  ;;  %p1074_p11 = scmp.lt.s32.totalorder %s54_s18, %s54_s18 }
  0x1a   :  { %p1070_p10 = scmp.ne.s32.totalorder %s54_s18, %s1069_s19  ;;  %p1075_p12 = scmp.lt.s32.totalorder %s1069_s19, %s1069_s19 }
  0x1c   :  { %p1076_p13 = por %p1075_p12, %p1074_p11 }
  0x1e   :  { %p1077_p0 = pnand %p1076_p13, %p1070_p10 }
  0x20   :  { %1080 = shalt.err (!%p1077_p0)
}
  0x21   :  { %59 = dma.hbm_to_vmem [thread:$0]  %s1205_s6, 4096, %s54_s18, [#allocation6], %s1109_s10, %s1109_s10, %s1110_s11  }
  0x22   :  { %1101 = dma.done.wait [#allocation3], 2048  }
  0x23   :  { %1102 = vsyncadd [#allocation3], 4294965248 }
  0x24   :  { %1103 = dma.done.wait [#allocation6], 8192  }
  0x25   :  { %1104 = vsyncadd [#allocation6], 4294959104  ;;  %v1112_v0 = vmov 0   ;;  %v897_v1 = vld [vmem:[#allocation2 + $0x74] ss:$8 sps:$4 sm:$0xff]   ;;  %vm755_vm4 = vcmask 7168  }
  0x26   :  { %213 = vmatprep.mubr.bf16.mxu0 %v1112_v0  ;;  %896 = vset.pattern.permute.xlu0 %v1112_v0  ;;  %v899_v2 = vld [vmem:[#allocation2 + $0x70] ss:$8 sps:$4 sm:$0xff]   ;;  %v900_v3 = vld [vmem:[#allocation2 + $0x64] ss:$8 sps:$4 sm:$0xff]   ;;  %v902_v4 = vld [vmem:[#allocation2 + $0x60] ss:$8 sps:$4 sm:$0xff]  }
  0x27   :  { %181 = vmatprep.subr.bf16.mxu0 %v897_v1  ;;  %v903_v5 = vld [vmem:[#allocation2 + $0x54] ss:$8 sps:$4 sm:$0xff]   ;;  %v905_v6 = vld [vmem:[#allocation2 + $0x50] ss:$8 sps:$4 sm:$0xff]   ;;  %v906_v7 = vld [vmem:[#allocation2 + $0x44] ss:$8 sps:$4 sm:$0xff]  }
  0x28   :  { %182 = vmatpush1.bf16.msra.mxu0 %v899_v2  ;;  %v908_v8 = vld [vmem:[#allocation2 + $0x40] ss:$8 sps:$4 sm:$0xff]   ;;  %v909_v9 = vld [vmem:[#allocation2 + $0x34] ss:$8 sps:$4 sm:$0xff]   ;;  %v923_v11 = vld [vmem:[#allocation5 + $0x70] ss:$8 sps:$4 sm:$0xff]  }
  0x29   :  { %183 = vmatprep.subr.bf16.mxu0 %v900_v3  ;;  %v921_v10 = vld [vmem:[#allocation5 + $0x74] ss:$8 sps:$4 sm:$0xff]   ;;  %v924_v12 = vld [vmem:[#allocation5 + $0x64] ss:$8 sps:$4 sm:$0xff]   ;;  %v911_v13 = vld [vmem:[#allocation2 + $0x30] ss:$8 sps:$4 sm:$0xff]  }
  0x2a   :  { %430 = vmatprep.subr.bf16.mxu1 %v921_v10  ;;  %v926_v14 = vld [vmem:[#allocation5 + $0x60] ss:$8 sps:$4 sm:$0xff]   ;;  %v927_v15 = vld [vmem:[#allocation5 + $0x54] ss:$8 sps:$4 sm:$0xff]   ;;  %v912_v16 = vld [vmem:[#allocation2 + $0x24] ss:$8 sps:$4 sm:$0xff]  }
  0x2b   :  { %431 = vmatpush1.bf16.msra.mxu1 %v923_v11  ;;  %v914_v17 = vld [vmem:[#allocation2 + $0x20] ss:$8 sps:$4 sm:$0xff]   ;;  %v929_v18 = vld [vmem:[#allocation5 + $0x50] ss:$8 sps:$4 sm:$0xff]   ;;  %v930_v19 = vld [vmem:[#allocation5 + $0x44] ss:$8 sps:$4 sm:$0xff]  }
  0x2c   :  { %184 = vmatpush1.bf16.msra.mxu0 %v902_v4  ;;  %432 = vmatprep.subr.bf16.mxu1 %v924_v12  ;;  %v915_v20 = vld [vmem:[#allocation2 + $0x14] ss:$8 sps:$4 sm:$0xff]   ;;  %v917_v21 = vld [vmem:[#allocation2 + $0x10] ss:$8 sps:$4 sm:$0xff]   ;;  %v932_v22 = vld [vmem:[#allocation5 + $0x40] ss:$8 sps:$4 sm:$0xff]  }
  0x2d   :  { %185 = vmatprep.subr.bf16.mxu0 %v903_v5  ;;  %v933_v23 = vld [vmem:[#allocation5 + $0x34] ss:$8 sps:$4 sm:$0xff]   ;;  %v918_v24 = vld [vmem:[#allocation2 + $0x4] ss:$8 sps:$4 sm:$0xff]   ;;  %v920_v25 = vld [vmem:[#allocation2] ss:$8 sps:$4 sm:$0xff]  }
  0x2e   :  { %v935_v26 = vld [vmem:[#allocation5 + $0x30] ss:$8 sps:$4 sm:$0xff]   ;;  %v936_v27 = vld [vmem:[#allocation5 + $0x24] ss:$8 sps:$4 sm:$0xff]   ;;  %v72_v28 = vld [vmem:[%s1199_s0] sm:$0xf] }
  0x2f   :  { %433 = vmatpush1.bf16.msra.mxu1 %v926_v14  ;;  %v938_v29 = vld [vmem:[#allocation5 + $0x20] ss:$8 sps:$4 sm:$0xff]   ;;  %v939_v30 = vld [vmem:[#allocation5 + $0x14] ss:$8 sps:$4 sm:$0xff]   ;;  %v941_v31 = vld [vmem:[#allocation5 + $0x10] ss:$8 sps:$4 sm:$0xff]   ;;  %v91_v14 = vlaneseq }
  0x30   :  { %186 = vmatpush1.bf16.msra.mxu0 %v905_v6  ;;  %434 = vmatprep.subr.bf16.mxu1 %v927_v15  ;;  %v942_v32 = vld [vmem:[#allocation5 + $0x4] ss:$8 sps:$4 sm:$0xff]   ;;  %v944_v33 = vld [vmem:[#allocation5] ss:$8 sps:$4 sm:$0xff]   ;;  %v945_v34 = vld [vmem:[#allocation5 + $0xf4] ss:$8 sps:$4 sm:$0xff]  }
  0x31   :  { %187 = vmatprep.subr.bf16.mxu0 %v906_v7  ;;  %v947_v35 = vld [vmem:[#allocation5 + $0xf0] ss:$8 sps:$4 sm:$0xff]   ;;  %v948_v36 = vld [vmem:[#allocation5 + $0xe4] ss:$8 sps:$4 sm:$0xff]   ;;  %v950_v37 = vld [vmem:[#allocation5 + $0xe0] ss:$8 sps:$4 sm:$0xff]  }
  0x32   :  { %v951_v38 = vld [vmem:[#allocation5 + $0xd4] ss:$8 sps:$4 sm:$0xff]   ;;  %v953_v39 = vld [vmem:[#allocation5 + $0xd0] ss:$8 sps:$4 sm:$0xff]   ;;  %v954_v40 = vld [vmem:[#allocation5 + $0xc4] ss:$8 sps:$4 sm:$0xff]  }
  0x33   :  { %435 = vmatpush1.bf16.msra.mxu1 %v929_v18  ;;  %v956_v41 = vld [vmem:[#allocation5 + $0xc0] ss:$8 sps:$4 sm:$0xff]   ;;  %v957_v42 = vld [vmem:[#allocation5 + $0xb4] ss:$8 sps:$4 sm:$0xff]   ;;  %v959_v43 = vld [vmem:[#allocation5 + $0xb0] ss:$8 sps:$4 sm:$0xff]  }
  0x34   :  { %188 = vmatpush1.bf16.msra.mxu0 %v908_v8  ;;  %436 = vmatprep.subr.bf16.mxu1 %v930_v19  ;;  %v960_v44 = vld [vmem:[#allocation5 + $0xa4] ss:$8 sps:$4 sm:$0xff]   ;;  %v962_v45 = vld [vmem:[#allocation5 + $0xa0] ss:$8 sps:$4 sm:$0xff]   ;;  %v963_v46 = vld [vmem:[#allocation5 + $0x94] ss:$8 sps:$4 sm:$0xff]  }
  0x35   :  { %189 = vmatprep.subr.bf16.mxu0 %v909_v9  ;;  %v965_v47 = vld [vmem:[#allocation5 + $0x90] ss:$8 sps:$4 sm:$0xff]   ;;  %v966_v48 = vld [vmem:[#allocation5 + $0x84] ss:$8 sps:$4 sm:$0xff]   ;;  %v968_v49 = vld [vmem:[#allocation5 + $0x80] ss:$8 sps:$4 sm:$0xff]  }
  0x36   :  { %v969_v50 = vld [vmem:[#allocation7 + $0x70] ss:$8 sps:$4 sm:$0xff]   ;;  %v971_v51 = vld [vmem:[#allocation7 + $0x74] ss:$8 sps:$4 sm:$0xff]   ;;  %v974_v52 = vld [vmem:[#allocation7 + $0x64] ss:$8 sps:$4 sm:$0xff]  }
  0x37   :  { %437 = vmatpush1.bf16.msra.mxu1 %v932_v22  ;;  %v972_v53 = vld [vmem:[#allocation7 + $0x60] ss:$8 sps:$4 sm:$0xff]   ;;  %v977_v54 = vld [vmem:[#allocation7 + $0x54] ss:$8 sps:$4 sm:$0xff]   ;;  %v975_v55 = vld [vmem:[#allocation7 + $0x50] ss:$8 sps:$4 sm:$0xff]  }
  0x38   :  { %190 = vmatpush1.bf16.msra.mxu0 %v911_v13  ;;  %438 = vmatprep.subr.bf16.mxu1 %v933_v23  ;;  %v980_v56 = vld [vmem:[#allocation7 + $0x44] ss:$8 sps:$4 sm:$0xff]   ;;  %v978_v57 = vld [vmem:[#allocation7 + $0x40] ss:$8 sps:$4 sm:$0xff]   ;;  %v983_v58 = vld [vmem:[#allocation7 + $0x34] ss:$8 sps:$4 sm:$0xff]  }
  0x39   :  { %191 = vmatprep.subr.bf16.mxu0 %v912_v16  ;;  %v981_v59 = vld [vmem:[#allocation7 + $0x30] ss:$8 sps:$4 sm:$0xff]   ;;  %v986_v60 = vld [vmem:[#allocation7 + $0x24] ss:$8 sps:$4 sm:$0xff]   ;;  %v984_v61 = vld [vmem:[#allocation7 + $0x20] ss:$8 sps:$4 sm:$0xff]  }
  0x3a   :  { %v989_v62 = vld [vmem:[#allocation7 + $0x14] ss:$8 sps:$4 sm:$0xff]   ;;  %v987_v63 = vld [vmem:[#allocation7 + $0x10] ss:$8 sps:$4 sm:$0xff]   ;;  %v992_v0 = vld [vmem:[#allocation7 + $0x4] ss:$8 sps:$4 sm:$0xff]  }
  0x3b   :  { %439 = vmatpush1.bf16.msra.mxu1 %v935_v26  ;;  %v990_v1 = vld [vmem:[#allocation7] ss:$8 sps:$4 sm:$0xff]   ;;  %v995_v2 = vld [vmem:[#allocation7 + $0xf4] ss:$8 sps:$4 sm:$0xff]   ;;  %v993_v3 = vld [vmem:[#allocation7 + $0xf0] ss:$8 sps:$4 sm:$0xff]  }
  0x3c   :  { %192 = vmatpush1.bf16.msra.mxu0 %v914_v17  ;;  %440 = vmatprep.subr.bf16.mxu1 %v936_v27  ;;  %v998_v4 = vld [vmem:[#allocation7 + $0xe4] ss:$8 sps:$4 sm:$0xff]   ;;  %v996_v5 = vld [vmem:[#allocation7 + $0xe0] ss:$8 sps:$4 sm:$0xff]   ;;  %v1001_v6 = vld [vmem:[#allocation7 + $0xd4] ss:$8 sps:$4 sm:$0xff]  }
  0x3d   :  { %193 = vmatprep.subr.bf16.mxu0 %v915_v20  ;;  %v999_v7 = vld [vmem:[#allocation7 + $0xd0] ss:$8 sps:$4 sm:$0xff]   ;;  %v1004_v8 = vld [vmem:[#allocation7 + $0xc4] ss:$8 sps:$4 sm:$0xff]   ;;  %v1002_v9 = vld [vmem:[#allocation7 + $0xc0] ss:$8 sps:$4 sm:$0xff]  }
  0x3e   :  { %v1007_v10 = vld [vmem:[#allocation7 + $0xb4] ss:$8 sps:$4 sm:$0xff]   ;;  %v1005_v11 = vld [vmem:[#allocation7 + $0xb0] ss:$8 sps:$4 sm:$0xff]   ;;  %v1010_v12 = vld [vmem:[#allocation7 + $0xa4] ss:$8 sps:$4 sm:$0xff]  }
  0x3f   :  { %441 = vmatpush1.bf16.msra.mxu1 %v938_v29  ;;  %v1008_v13 = vld [vmem:[#allocation7 + $0xa0] ss:$8 sps:$4 sm:$0xff]   ;;  %v1172_v15 = vshrl.u32 %v91_v14, 7 }
  0x40   :  { %194 = vmatpush1.bf16.msra.mxu0 %v917_v21  ;;  %442 = vmatprep.subr.bf16.mxu1 %v939_v30  ;;  %v89_v17 = vld [vmem:[%s1202_s3] sm:$0x3] }
  0x41   :  { %195 = vmatprep.subr.bf16.mxu0 %v918_v24  ;;  %v93_v16 = vsub.s32 0, %v1172_v15  ;;  %v97_v18 = vsub.s32 1, %v1172_v15  ;;  %vm777_vm5 = vcmp.eq.s32.totalorder %v1172_v15, 0 }
  0x43   :  { %443 = vmatpush1.bf16.msra.mxu1 %v941_v31  ;;  %v94_v19 = vrot.slane %v89_v17, %v93_v16  ;;  %v98_v20 = vrot.slane %v89_v17, %v97_v18  ;;  %v1013_v31 = vld [vmem:[#allocation7 + $0x94] ss:$8 sps:$4 sm:$0xff]  }
  0x44   :  { %196 = vmatpush1.bf16.msra.mxu0 %v920_v25  ;;  %444 = vmatprep.subr.bf16.mxu1 %v942_v32  ;;  %v1011_v32 = vld [vmem:[#allocation7 + $0x90] ss:$8 sps:$4 sm:$0xff]  }
  0x45   :  { %674 = vmatprep.subr.bf16.mxu0 %v971_v51 }
  0x47   :  { %214 = vmatmul.mubr.bf16.vlgmr.msra.gmra.mxu0 %v72_v28  ;;  %445 = vmatpush1.bf16.msra.mxu1 %v944_v33  ;;  %v1016_v33 = vld [vmem:[#allocation7 + $0x84] ss:$8 sps:$4 sm:$0xff]  }
  0x48   :  { %446 = vmatprep.subr.bf16.mxu1 %v945_v34  ;;  %675 = vmatpush1.bf16.msra.mxu0 %v969_v50  ;;  %v1014_v34 = vld [vmem:[#allocation7 + $0x80] ss:$8 sps:$4 sm:$0xff]  }
  0x49   :  { %676 = vmatprep.subr.bf16.mxu0 %v974_v52 }
  0x4b   :  { %447 = vmatpush2.bf16.msra.mxu1 %v947_v35  ;;  %v258_v35 = vld [vmem:[%s1204_s5] sm:$0x3] }
  0x4c   :  { %448 = vmatprep.subr.bf16.mxu1 %v948_v36  ;;  %677 = vmatpush1.bf16.msra.mxu0 %v972_v53  ;;  %v263_v36 = vrot.slane %v258_v35, %v93_v16 }
  0x4d   :  { %678 = vmatprep.subr.bf16.mxu0 %v977_v54 }
  0x4f   :  { %449 = vmatpush2.bf16.msra.mxu1 %v950_v37  ;;  %v267_v37 = vrot.slane %v258_v35, %v97_v18 }
  0x50   :  { %450 = vmatprep.subr.bf16.mxu1 %v951_v38  ;;  %679 = vmatpush1.bf16.msra.mxu0 %v975_v55 }
  0x51   :  { %680 = vmatprep.subr.bf16.mxu0 %v980_v56 }
  0x53   :  { %451 = vmatpush2.bf16.msra.mxu1 %v953_v39 }
  0x54   :  { %452 = vmatprep.subr.bf16.mxu1 %v954_v40  ;;  %681 = vmatpush1.bf16.msra.mxu0 %v978_v57  ;;  %v725_v57 = vld [vmem:[%s1200_s1] sm:$0xff] }
  0x55   :  { %682 = vmatprep.subr.bf16.mxu0 %v983_v58 }
  0x57   :  { %453 = vmatpush2.bf16.msra.mxu1 %v956_v41 }
  0x58   :  { %454 = vmatprep.subr.bf16.mxu1 %v957_v42  ;;  %683 = vmatpush1.bf16.msra.mxu0 %v981_v59 }
  0x59   :  { %684 = vmatprep.subr.bf16.mxu0 %v986_v60 }
  0x5b   :  { %455 = vmatpush2.bf16.msra.mxu1 %v959_v43 }
  0x5c   :  { %456 = vmatprep.subr.bf16.mxu1 %v960_v44  ;;  %685 = vmatpush1.bf16.msra.mxu0 %v984_v61 }
  0x5d   :  { %686 = vmatprep.subr.bf16.mxu0 %v989_v62 }
  0x5f   :  { %457 = vmatpush2.bf16.msra.mxu1 %v962_v45 }
  0x60   :  { %458 = vmatprep.subr.bf16.mxu1 %v963_v46  ;;  %687 = vmatpush1.bf16.msra.mxu0 %v987_v63 }
  0x61   :  { %688 = vmatprep.subr.bf16.mxu0 %v992_v0 }
  0x63   :  { %459 = vmatpush2.bf16.msra.mxu1 %v965_v47 }
  0x64   :  { %460 = vmatprep.subr.bf16.mxu1 %v966_v48  ;;  %689 = vmatpush1.bf16.msra.mxu0 %v990_v1  ;;  %v507_v48 = vld [vmem:[%s1206_s7] sm:$0x3]  ;;  %s1114_s7 = smov [#allocation8]  }
  0x65   :  { %690 = vmatprep.subr.bf16.mxu0 %v995_v2  ;;  %v512_v50 = vrot.slane %v507_v48, %v93_v16  ;;  %s793_s26 = sshll.u32 %s1114_s7, 4  ;;  %s794_s26 = int_to_ptr.vmem [resolvable:$true] %s793_s26 }
  0x66   :  { %s1081_s28 = scalar_lea.vmem %s794_s26, 128  ;;  %p1086_p2 = scmp.lt.s32.totalorder %s794_s26, %s794_s26 }
  0x67   :  { %461 = vmatpush2.bf16.msra.mxu1 %v968_v49  ;;  %v1185_v49 = vand.u32 127, %v91_v14  ;;  %p1082_p1 = scmp.ne.s32.totalorder %s794_s26, %s1081_s28  ;;  %p1087_p3 = scmp.lt.s32.totalorder %s1081_s28, %s1081_s28 }
  0x68   :  { %691 = vmatpush2.bf16.msra.mxu0 %v993_v3 }
  0x69   :  { %692 = vmatprep.subr.bf16.mxu0 %v998_v4  ;;  %vm716_vm0 = vcmp.lt.s32.totalorder %v1185_v49, 8  ;;  %v738_v0 = vcvt.s32.f32 %v1185_v49  ;;  %vm778_vm6 = vcmp.eq.s32.totalorder %v1185_v49, 0  ;;  %vm782_vm7 = vcmp.eq.s32.totalorder %v1185_v49, 1  ;;  %p1088_p4 = por %p1087_p3, %p1086_p2 }
  0x6a   :  { %vm779_vm8 = vmand %vm777_vm5, %vm778_vm6 }
  0x6b   :  { %vm783_vm9 = vmand %vm777_vm5, %vm782_vm7  ;;  %p1089_p5 = pnand %p1088_p4, %p1082_p1 }
  0x6c   :  { %693 = vmatpush2.bf16.msra.mxu0 %v996_v5 }
  0x6d   :  { %694 = vmatprep.subr.bf16.mxu0 %v1001_v6  ;;  %v742_v6 = vcvt.s32.f32 %v725_v57 }
  0x70   :  { %695 = vmatpush2.bf16.msra.mxu0 %v999_v7 }
  0x71   :  { %696 = vmatprep.subr.bf16.mxu0 %v1004_v8 }
  0x74   :  { %697 = vmatpush2.bf16.msra.mxu0 %v1002_v9 }
  0x75   :  { %698 = vmatprep.subr.bf16.mxu0 %v1007_v10 }
  0x78   :  { %699 = vmatpush2.bf16.msra.mxu0 %v1005_v11  ;;  %v1113_v11 = vmov 0.0  }
  0x79   :  { %700 = vmatprep.subr.bf16.mxu0 %v1010_v12 }
  0x7c   :  { %701 = vmatpush2.bf16.msra.mxu0 %v1008_v13 }
  0x7d   :  { %702 = vmatprep.subr.bf16.mxu0 %v1013_v31 }
  0x80   :  { %703 = vmatpush2.bf16.msra.mxu0 %v1011_v32 }
  0x81   :  { %704 = vmatprep.subr.bf16.mxu0 %v1016_v33 }
  0x84   :  { %705 = vmatpush2.bf16.msra.mxu0 %v1014_v34 }
 0x107   :  { %v215_v21 = vpop.f32.mrf.mxu0 }
 0x108   :  { %v216_v22 = vadd.f32 %v215_v21, %v94_v19 }
 0x109   :  { %v217_v23 = vpop.f32.mrf.mxu0 }
 0x10a   :  { %v218_v24 = vadd.f32 %v217_v23, %v98_v20  ;;  %v222_v25 = vmax.f32 %v216_v22, 0.0 }
 0x10b   :  { %v219_v26 = vpop.f32.mrf.mxu0 }
 0x10c   :  { %v223_v27 = vmax.f32 %v218_v24, 0.0  ;;  %v224_v30 = vpack.c.bf16 %v222_v25, %v222_v25 }
 0x10d   :  { %v220_v28 = vpop.f32.mrf.mxu0 }
 0x10e   :  { %v225_v29 = vpack.c.bf16 %v223_v27, %v223_v27 }
 0x110   :  { %462 = vmatprep.mubr.bf16.mxu1 %v225_v29 }
 0x111   :  { %463 = vmatmul.mubr.bf16.vlgmr.msra.gmra.mxu1 %v224_v30 }
 0x1d1   :  { %v464_v38 = vpop.f32.mrf.mxu1 }
 0x1d2   :  { %v465_v39 = vadd.f32 %v464_v38, %v263_v36 }
 0x1d3   :  { %v466_v40 = vpop.f32.mrf.mxu1 }
 0x1d4   :  { %v467_v41 = vadd.f32 %v466_v40, %v267_v37  ;;  %v471_v42 = vmax.f32 %v465_v39, 0.0 }
 0x1d5   :  { %v468_v43 = vpop.f32.mrf.mxu1 }
 0x1d6   :  { %v472_v44 = vmax.f32 %v467_v41, 0.0  ;;  %v473_v47 = vpack.c.bf16 %v471_v42, %v471_v42 }
 0x1d7   :  { %v469_v45 = vpop.f32.mrf.mxu1 }
 0x1d8   :  { %v474_v46 = vpack.c.bf16 %v472_v44, %v472_v44 }
 0x1da   :  { %706 = vmatprep.mubr.bf16.mxu0 %v474_v46 }
 0x1db   :  { %707 = vmatmul.mubr.bf16.vlgmr.msra.gmra.mxu0 %v473_v47 }
 0x29b   :  { %v708_v51 = vpop.f32.mrf.mxu0 }
 0x29c   :  { %v709_v52 = vadd.f32 %v708_v51, %v512_v50 }
 0x29d   :  { %v710_v53 = vpop.f32.mrf.mxu0 }
 0x29e   :  { %v717_v54 = vsel %vm716_vm0, %v709_v52, -1e+30 }
 0x29f   :  { %v711_v55 = vpop.f32.mrf.mxu0  ;;  %718 = vmax.xlane.f32.xlu0 %v717_v54 }
 0x2a1   :  { %v712_v56 = vpop.f32.mrf.mxu0 }
 0x2b5   :  { %727 = vperm.xlu0 %896, %v725_v57  }
 0x328   :  { %v719_v58 = vpop.xlane.xlu0 %718 }
 0x329   :  { %v720_v59 = vsub.f32 %v717_v54, %v719_v58  ;;  %vm737_vm2 = vcmp.eq.f32.partialorder %v717_v54, %v719_v58 }
 0x32a   :  { %v739_v1 = vsel %vm737_vm2, %v738_v0, 128.0 }
 0x32b   :  { %v721_v60 = vmul.f32 1.442695, %v720_v59 }
 0x32d   :  { %1017 = vpow2.f32 %v721_v60 }
 0x330   :  { %v728_v61 = vpop.permute.xlu0 %727 }
 0x331   :  { %vm729_vm1 = vcmp.eq.s32.totalorder %v1185_v49, %v728_v61 }
 0x332   :  { %v730_v63 = vsel %vm729_vm1, %v717_v54, 0.0 }
 0x33a   :  { %v1018_v62 = vpop.eup %1017 }
 0x33b   :  { %723 = vadd.xlane.f32.xlu1 %v1018_v62 }
 0x33f   :  { %731 = vadd.xlane.f32.xlu1 %v730_v63 }
 0x343   :  { %740 = vmin.xlane.f32.xlu1 %v739_v1 }
 0x3c4   :  { %v724_v2 = vpop.xlane.xlu1 %723 }
 0x3c5   :  { %1019 = vlog2.f32 %v724_v2 }
 0x3c8   :  { %v732_v3 = vpop.xlane.xlu1 %731 }
 0x3cc   :  { %v741_v7 = vpop.xlane.xlu1 %740 }
 0x3cd   :  { %vm743_vm3 = vcmp.eq.f32.partialorder %v741_v7, %v742_v6 }
 0x3ce   :  { %v883_v12 = vsel %vm743_vm3, 1.0, %v1113_v11 }
 0x3cf   :  { %v767_v13 = vsel %vm755_vm4, %v883_v12, 0.0 }
 0x3d2   :  { %v1020_v4 = vpop.eup %1019 }
 0x3d3   :  { %v734_v5 = vmul.f32 0.6931472, %v1020_v4 }
 0x3d5   :  { %v735_v8 = vadd.f32 %v734_v5, %v719_v58 }
 0x3d7   :  { %v736_v9 = vsub.f32 %v735_v8, %v732_v3 }
 0x3d9   :  { %v756_v10 = vsel %vm755_vm4, %v736_v9, 0.0 }
 0x3da   :  { %757 = vadd.xlane.f32.xlu1 %v756_v10 }
 0x3de   :  { %768 = vadd.xlane.f32.xlu1 %v767_v13 }
 0x463   :  { %v758_v14 = vpop.xlane.xlu1 %757 }
 0x464   :  { %v759_v16 = vrot.slane %v758_v14, 4 }
 0x466   :  { %v760_v17 = vadd.f32 %v759_v16, %v758_v14 }
 0x467   :  { %v769_v18 = vpop.xlane.xlu1 %768 }
 0x468   :  { %v761_v19 = vrot.slane %v760_v17, 2  ;;  %v770_v20 = vrot.slane %v769_v18, 4 }
 0x46a   :  { %v771_v21 = vadd.f32 %v770_v20, %v769_v18  ;;  %v762_v22 = vadd.f32 %v761_v19, %v760_v17 }
 0x46c   :  { %v772_v23 = vrot.slane %v771_v21, 2  ;;  %v763_v24 = vrot.slane %v762_v22, 1 }
 0x46e   :  { %v773_v25 = vadd.f32 %v772_v23, %v771_v21  ;;  %v764_v26 = vadd.f32 %v763_v24, %v762_v22 }
 0x470   :  { %884 = vpush %v764_v26  ;;  %v774_v27 = vrot.slane %v773_v25, 1 }
 0x472   :  { %v775_v28 = vadd.f32 %v774_v27, %v773_v25 }
 0x474   :  { %886 = vpush %v775_v28 }
 0x4a1   :  { %s885_s1 = spop %884 }
 0x4a2   :  { %v780_v29 = vstv %s885_s1 }
 0x4a3   :  { %v781_v30 = vsel %vm779_vm8, %v780_v29, 0.0 }
 0x4a5   :  { %s887_s27 = spop %886 }
 0x4a6   :  { %v784_v31 = vstv %s887_s27 }
 0x4a7   :  { %v785_v32 = vsel %vm783_vm9, %v784_v31, %v781_v30 }
 0x4a8   :  { %786 = vst [vmem:[#allocation8] sm:$0xff] %v785_v32 }
 0x4a9   :  { %1092 = shalt.err (!%p1089_p5)
}
 0x4aa   :  { %796 = dma.vmem_to_hbm [thread:$0]  %s794_s26, 128, %s1207_s8, [#allocation4]  }
 0x4ab   :  { %1105 = dma.done.wait [#allocation4], 128  }
 0x4ac   :  { %1106 = vsyncadd [#allocation4], 4294967168 }
 0x4ad   :  { %800 = vsyncpa [#allocation3], 1 }
 0x4ae   :  { %801 = vsyncpa [#allocation6], 1 }
 0x4af   :  { %802 = vsyncpa [#allocation4], 1 }

</bundles_post_ra>
